<compile_context>
chip_gen: v7x
topology: tpu7x:2x2x1
jax: 0.10.0
libtpu: 0.0.40
codegen_flags: <defaults>
</compile_context>

<pallas_src>
import functools

import jax
import jax.numpy as jnp
import numpy as np
from jax.experimental import pallas as pl
from jax.experimental.pallas import tpu as pltpu


def _build_avg_matrix(L: int, kernel_size: int) -> np.ndarray:
    """Banded averaging matrix W of shape (L, L), trace-time numpy constant.

    W[t, s] = 1/cnt(t) for s in [max(0, t-half), min(L-1, t+half)], else 0, which is
    exactly AvgPool1d(kernel_size, stride=1, padding=kernel_size//2,
    count_include_pad=False) along the sequence axis:  trend[b] = W @ x[b].
    """
    half = kernel_size // 2
    t = np.arange(L)
    lo = np.maximum(0, t - half)
    hi = np.minimum(L - 1, t + half)
    cnt = (hi - lo + 1).astype(np.float32)           # in-bounds tap count per position
    s = np.arange(L)
    band = (s[None, :] >= lo[:, None]) & (s[None, :] <= hi[:, None])
    return band.astype(np.float32) / cnt[:, None]    # (L, L)


def _decomp_kernel(w_ref, x_ref, trend_ref, res_ref, *, precision):
    # w_ref:     (L, L)  VMEM-resident averaging matrix (weights embed 1/count)
    # x_ref:     (1, L, Ct)  one batch, one channel tile (native layout, no transpose)
    # trend_ref: (1, L, Ct)
    # res_ref:   (1, L, Ct)
    x = x_ref[0]                                                   # (L, Ct)
    trend = jnp.dot(w_ref[...], x,
                    precision=precision,
                    preferred_element_type=jnp.float32)            # (L, Ct) f32 accum
    trend_ref[0] = trend.astype(trend_ref.dtype)
    res_ref[0] = (x.astype(jnp.float32) - trend).astype(res_ref.dtype)


def series_decomposition(x, kernel_size: int, *, channel_block_bytes: int = 4 << 20):
    """Returns (trend, seasonal_residual), each with the same shape/dtype as x.

    x: (B, L, C) channels-last; moving average is taken along L.
    """
    assert kernel_size % 2 == 1, "kernel_size must be odd so trend matches x's length"
    B, L, C = x.shape
    itemsize = x.dtype.itemsize

    # Precision / weight-dtype policy (see header): f32 -> exact-parity HIGHEST path,
    # bf16 -> native single-pass bf16 MXU with f32 accumulation.
    if x.dtype == jnp.bfloat16:
        w_dtype, precision = jnp.bfloat16, None
    else:
        w_dtype, precision = jnp.float32, jax.lax.Precision.HIGHEST

    W = jnp.asarray(_build_avg_matrix(L, kernel_size), dtype=w_dtype)

    # Channel tile: full C when it is already <= 128 lanes; otherwise a lane-aligned
    # tile targeting ~channel_block_bytes per (L, Ct) block (bigger tiles -> fewer
    # grid steps, better HBM-roofline utilization).  Partial last block is fine.
    if C <= 128:
        Ct = C
    else:
        lanes = max(128, channel_block_bytes // max(1, L * itemsize))
        Ct = max(128, (lanes // 128) * 128)
        Ct = min(Ct, (C // 128) * 128)
    n_c = pl.cdiv(C, Ct)
    grid = (B, n_c)

    # VMEM budget: W single-buffered + (x, trend, res) double-buffered tiles + slack.
    w_bytes = L * L * jnp.dtype(w_dtype).itemsize
    io_bytes = 3 * 2 * L * Ct * itemsize
    vmem_limit = int(min(max(w_bytes + io_bytes + (2 << 20), 32 << 20), 120 << 20))

    cost = pl.CostEstimate(
        flops=2 * B * L * L * C,
        transcendentals=0,
        bytes_accessed=w_bytes + 3 * B * L * C * itemsize,
    )

    trend, seasonal = pl.pallas_call(
        functools.partial(_decomp_kernel, precision=precision),
        out_shape=(
            jax.ShapeDtypeStruct((B, L, C), x.dtype),
            jax.ShapeDtypeStruct((B, L, C), x.dtype),
        ),
        grid=grid,
        in_specs=[
            # Averaging matrix: constant block index -> DMA'd once, stays resident;
            # single-buffered since it never changes across the grid.
            pl.BlockSpec((L, L), lambda b, c: (0, 0), pipeline_mode=pl.Buffered(1)),
            # One batch, one channel tile of x, in its native layout.
            pl.BlockSpec((1, L, Ct), lambda b, c: (b, 0, c)),
        ],
        out_specs=(
            pl.BlockSpec((1, L, Ct), lambda b, c: (b, 0, c)),
            pl.BlockSpec((1, L, Ct), lambda b, c: (b, 0, c)),
        ),
        compiler_params=pltpu.CompilerParams(
            dimension_semantics=("parallel", "parallel"),
            vmem_limit_bytes=vmem_limit,
        ),
        cost_estimate=cost,
    )(W, x)
    return trend, seasonal


def _reference(x_np, kernel_size):
    # Pure-numpy reference matching AvgPool1d(stride=1, padding=k//2,
    # count_include_pad=False) applied along the L axis of (B, L, C).
    B, L, C = x_np.shape
    half = kernel_size // 2
    trend = np.empty((B, L, C), dtype=np.float32)
    for t in range(L):
        lo, hi = max(0, t - half), min(L, t + half + 1)
        trend[:, t, :] = x_np[:, lo:hi, :].astype(np.float32).mean(axis=1)
    return trend, x_np.astype(np.float32) - trend


if __name__ == "__main__":
    B, L, C = 2, 16, 8
    kernel_size = 5  # SeriesDecomposition(kernel_size=5); the module has no learned params

    key = jax.random.PRNGKey(0)
    x = jax.random.normal(key, (B, L, C), dtype=jnp.float32)

    trend, seasonal = series_decomposition(x, kernel_size)
    trend = jax.block_until_ready(trend)
    seasonal = jax.block_until_ready(seasonal)

    trend_ref, seasonal_ref = _reference(np.asarray(x), kernel_size)
    np.testing.assert_allclose(np.asarray(trend), trend_ref, rtol=1e-5, atol=1e-5)
    np.testing.assert_allclose(np.asarray(seasonal), seasonal_ref, rtol=1e-5, atol=1e-5)

    print("KERNEL_OK")
</pallas_src>

<mosaic_0001>
module attributes {stable_mosaic.version = 11 : i64} {
  func.func @_decomp_kernel(%arg0: i32, %arg1: i32, %arg2: memref<16x16xf32, #tpu.memory_space<vmem>>, %arg3: memref<1x16x8xf32, #tpu.memory_space<vmem>>, %arg4: memref<1x16x8xf32, #tpu.memory_space<vmem>>, %arg5: memref<1x16x8xf32, #tpu.memory_space<vmem>>) attributes {dimension_semantics = [#tpu.dimension_semantics<parallel>, #tpu.dimension_semantics<parallel>], iteration_bounds = array<i64: 2, 1>, scalar_prefetch = 0 : i64, scratch_operands = 0 : i64, tpu.core_type = #tpu.core_type<tc>, window_params = [{pipeline_mode = #tpu.pipeline_mode<synchronous>, transform_indices = @transform_0, window_bounds = array<i64: 16, 16>}, {transform_indices = @transform_1, window_bounds = array<i64: 1, 16, 8>}, {transform_indices = @transform_2, window_bounds = array<i64: 1, 16, 8>}, {transform_indices = @transform_3, window_bounds = array<i64: 1, 16, 8>}]} {
    %c0 = arith.constant 0 : index
    %c0_0 = arith.constant 0 : index
    %c0_1 = arith.constant 0 : index
    %0 = vector.load %arg3[%c0, %c0_0, %c0_1] : memref<1x16x8xf32, #tpu.memory_space<vmem>>, vector<1x16x8xf32>
    %1 = vector.shape_cast %0 : vector<1x16x8xf32> to vector<16x8xf32>
    %c0_2 = arith.constant 0 : index
    %c0_3 = arith.constant 0 : index
    %2 = vector.load %arg2[%c0_2, %c0_3] : memref<16x16xf32, #tpu.memory_space<vmem>>, vector<16x16xf32>
    %cst = arith.constant dense<0.000000e+00> : vector<16x8xf32>
    %3 = tpu.matmul %2, %1, %cst {dimension_numbers = #tpu.dot_dimension_numbers<[1], [0], [0], [1], [0, 0, 1, 1], [], []>, precision = #tpu.contract_precision<fp32>} : vector<16x16xf32>, vector<16x8xf32>, vector<16x8xf32> -> vector<16x8xf32>
    %c0_4 = arith.constant 0 : index
    %c0_5 = arith.constant 0 : index
    %c0_6 = arith.constant 0 : index
    %4 = vector.load %arg4[%c0_4, %c0_5, %c0_6] : memref<1x16x8xf32, #tpu.memory_space<vmem>>, vector<1x16x8xf32>
    %5 = vector.shape_cast %4 : vector<1x16x8xf32> to vector<16x8xf32>
    %6 = vector.shape_cast %3 : vector<16x8xf32> to vector<1x16x8xf32>
    tpu.vector_store %arg4[%c0_4, %c0_5, %c0_6], %6 {strides = array<i32>} : memref<1x16x8xf32, #tpu.memory_space<vmem>>, vector<1x16x8xf32>,
    %7 = arith.subf %1, %3 : vector<16x8xf32>
    %c0_7 = arith.constant 0 : index
    %c0_8 = arith.constant 0 : index
    %c0_9 = arith.constant 0 : index
    %8 = vector.load %arg5[%c0_7, %c0_8, %c0_9] : memref<1x16x8xf32, #tpu.memory_space<vmem>>, vector<1x16x8xf32>
    %9 = vector.shape_cast %8 : vector<1x16x8xf32> to vector<16x8xf32>
    %10 = vector.shape_cast %7 : vector<16x8xf32> to vector<1x16x8xf32>
    tpu.vector_store %arg5[%c0_7, %c0_8, %c0_9], %10 {strides = array<i32>} : memref<1x16x8xf32, #tpu.memory_space<vmem>>, vector<1x16x8xf32>,
    return
  }
  func.func @transform_0(%arg0: i32, %arg1: i32) -> (i32, i32) {
    %c0_i32 = arith.constant 0 : i32
    %c0_i32_0 = arith.constant 0 : i32
    %c0_i32_1 = arith.constant 0 : i32
    return %c0_i32, %c0_i32_0 : i32, i32
  }
  func.func @transform_1(%arg0: i32, %arg1: i32) -> (i32, i32, i32) {
    %c0_i32 = arith.constant 0 : i32
    %c0_i32_0 = arith.constant 0 : i32
    return %arg0, %c0_i32, %arg1 : i32, i32, i32
  }
  func.func @transform_2(%arg0: i32, %arg1: i32) -> (i32, i32, i32) {
    %c0_i32 = arith.constant 0 : i32
    %c0_i32_0 = arith.constant 0 : i32
    return %arg0, %c0_i32, %arg1 : i32, i32, i32
  }
  func.func @transform_3(%arg0: i32, %arg1: i32) -> (i32, i32, i32) {
    %c0_i32 = arith.constant 0 : i32
    %c0_i32_0 = arith.constant 0 : i32
    return %arg0, %c0_i32, %arg1 : i32, i32, i32
  }
}

</mosaic_0001>

<bundles_post_ra>
// kernel: tpu_custom_call.1
= control target key start
LH: loop header
LB: loop body
LE: loop exit
PB: predicated region body
PF: predicated region fallthrough
CT: control target
= control target key end

     0   :  { %s1057_s12 = smov 0   ;;  %s1059_s13 = smov 0   ;;  %s1104_s0 = inlined_call_operand.vmem [shape: f32[16,16], index: 0, kind: input, shape index: {}]   ;;  %s1105_s1 = inlined_call_operand.vmem [shape: f32[2,16,8], index: 1, kind: input, shape index: {}]   ;;  %s1106_s2 = inlined_call_operand.vmem [shape: f32[2,16,8], index: 2, kind: output, shape index: {0}]   ;;  %s1107_s3 = inlined_call_operand.vmem [shape: f32[2,16,8], index: 3, kind: output, shape index: {1}]  }
   0x1   :  { %s1061_s14 = smov 0  }
   0x2 LB: > { %s26_s15 = sadd.s32 1, %s1031_s13  ;;  %p877_p0 = scmp.ge.s32.totalorder %s1035_s14, 1  ;;  %s1035_s14 = sphi %s1061_s14, %s14_s14   ;;  %s1031_s13 = sphi %s1059_s13, %s1109_s13   ;;  %s1027_s12 = sphi %s1057_s12, %s1108_s12  }
   0x3   : > { %p28_p1 = scmp.ge.s32.totalorder %s26_s15, 2  ;;  %p161_p2 = scmp.lt.s32.totalorder %s1035_s14, 3 }
   0x5   : > { %s1111_s15 = smov (%p28_p1, %s26_s15), 0  ;;  %p162_p3 = pnand %p877_p0, %p161_p2 }
   0x6   : > { %p199_p4 = scmp.lt.s32.totalorder (!%p162_p3), %s1027_s12, 1  ;;  %v225_v0 = vld [vmem:[%s1104_s0] sm:$0xff] (!%p162_p3)  ;;  %v226_v1 = vld [vmem:[%s1104_s0 + $0x8] sm:$0xff] (!%p162_p3)  ;;  %vm227_vm0 = vcmask (!%p162_p3), 130048   ;;  %vm736_vm1 = vcmask (!%p162_p3), 64512  }
   0x7   : > { %165 = sbr.rel (%p162_p3) target bundleno = 260 (0x104), region = 28  ;;  %v229_v2 = vsel (!%p162_p3), %vm227_vm0, %v225_v0, 0  ;;  %v232_v3 = vsel (!%p162_p3), %vm227_vm0, %v226_v1, 0 }
   0x8   : > { %v301_v4 = vand.u32 (!%p162_p3), 4294901760, %v229_v2  ;;  %v311_v5 = vand.u32 (!%p162_p3), 4294901760, %v232_v3 }
   0xa   : > { %v302_v6 = vsub.f32 (!%p162_p3), %v229_v2, %v301_v4  ;;  %v312_v7 = vsub.f32 (!%p162_p3), %v232_v3, %v311_v5 }
   0xc   : > { %v303_v10 = vand.u32 (!%p162_p3), 4294901760, %v302_v6  ;;  %v313_v11 = vand.u32 (!%p162_p3), 4294901760, %v312_v7 }
   0xe   : > { %s1113_s12 = smov (!%p199_p4, %s1027_s12), 1  ;;  %v304_v14 = vsub.f32 %v302_v6, %v303_v10  ;;  %938 = vmatprep.mubr.f32.mxu0 %v303_v10  ;;  %v314_v15 = vsub.f32 %v312_v7, %v313_v11 }
   0xf   : > { %s1081_s20 = sshll.u32 %s1113_s12, 4 }
  0x10   : > { %s206_s23 = scalar_lea.vmem %s1105_s1, %s1081_s20  ;;  %v305_v19 = vand.u32 4294901760, %v304_v14  ;;  %v315_v20 = vand.u32 4294901760, %v314_v15  ;;  %s214_s26 = scalar_lea.vmem %s1106_s2, %s1081_s20 }
  0x11   : > { %v223_v8 = vld [vmem:[%s206_s23] sm:$0xff]  ;;  %v224_v9 = vld [vmem:[%s206_s23 + $0x8] sm:$0xff]  ;;  %s222_s29 = scalar_lea.vmem %s1107_s3, %s1081_s20 }
  0x12   : > { %v235_v12 = vand.u32 4294901760, %v223_v8  ;;  %v238_v13 = vand.u32 4294901760, %v224_v9  ;;  %917 = vmatprep.mubr.f32.mxu1 %v305_v19 }
  0x14   : > { %v955_v16 = vpack.c.bf16 %v238_v13, %v235_v12  ;;  %v323_v17 = vsub.f32 %v223_v8, %v235_v12  ;;  %v330_v18 = vsub.f32 %v224_v9, %v238_v13 }
  0x16   : > { %956 = vmatprep.subr.bf16.mxu1 %v955_v16  ;;  %968 = vmatprep.subr.bf16.mxu0 %v955_v16  ;;  %v324_v21 = vand.u32 4294901760, %v323_v17  ;;  %v331_v22 = vand.u32 4294901760, %v330_v18  ;;  %v963_v29 = vpack.c.bf16 %v330_v18, %v323_v17 }
  0x17   : > { %958 = vmatpush3.bf16.msra.mxu1 %v955_v16  ;;  %970 = vmatpush3.bf16.msra.mxu0 %v955_v16 }
  0x18   : > { %v325_v23 = vsub.f32 %v323_v17, %v324_v21  ;;  %v332_v24 = vsub.f32 %v330_v18, %v331_v22  ;;  %v971_v25 = vpack.c.bf16 %v331_v22, %v324_v21 }
  0x1a   : > { %918 = vmatmul.mubr.f32.vlgmr.msra.gmra.mrb[0].mxu1 %v315_v20  ;;  %939 = vmatmul.mubr.f32.vlgmr.msra.gmra.mrb[0].mxu0 %v313_v11  ;;  %v326_v26 = vand.u32 4294901760, %v325_v23  ;;  %v333_v27 = vand.u32 4294901760, %v332_v24 }
  0x1b   : > { %972 = vmatprep.subr.bf16.mxu0 %v971_v25  ;;  %924 = vmatprep.mubr.f32.mxu1 %v301_v4 }
  0x1c   : > { %v959_v28 = vpack.c.bf16 %v333_v27, %v326_v26  ;;  %974 = vmatpush3.bf16.msra.mxu0 %v971_v25  ;;  %945 = vmatprep.mubr.f32.mxu0 %v301_v4 }
  0x1d   : > { %976 = vmatprep.subr.bf16.mxu0 %v955_v16 }
  0x1e   : > { %960 = vmatprep.subr.bf16.mxu1 %v959_v28 }
  0x1f   : > { %962 = vmatpush3.bf16.msra.mxu1 %v959_v28 }
  0x20   : > { %964 = vmatprep.subr.bf16.mxu1 %v963_v29 }
  0x22   : > { %925 = vmatmul.mubr.f32.vlgmr.msra.gmra.mrb[0].mxu1 %v311_v5  ;;  %946 = vmatmul.mubr.f32.vlgmr.msra.gmra.mrb[0].mxu0 %v311_v5 }
  0x23   : > { %966 = vmatpush3.bf16.msra.mxu1 %v963_v29  ;;  %978 = vmatpush3.bf16.msra.mxu0 %v955_v16 }
  0x24   : > { %931 = vmatprep.mubr.f32.mxu1 %v302_v6  ;;  %952 = vmatprep.mubr.f32.mxu0 %v301_v4 }
  0x2a   : > { %932 = vmatmul.mubr.f32.vlgmr.msra.gmra.mrb[0].mxu1 %v312_v7  ;;  %953 = vmatmul.mubr.f32.vlgmr.msra.gmra.mrb[0].mxu0 %v311_v5 }
  0xfd   : > { %v933_v30 = vpop.f32.mrb[0].mxu1  ;;  %v954_v31 = vpop.f32.mrb[0].mxu0 }
  0xfe   : > { %v979_v32 = vadd.f32 %v954_v31, %v933_v30  ;;  %v480_v33 = vpop.f32.mrb[1].mxu1  ;;  %v726_v34 = vpop.f32.mrb[1].mxu0 }
  0xff   : > { %v980_v35 = vadd.f32 %v726_v34, %v480_v33 }
 0x100   : > { %738 = vst.msk [vmem:[%s214_s26 + $0x8] sm:$0xff] %vm736_vm1, %v979_v32  ;;  %v740_v36 = vsub.f32 %v224_v9, %v979_v32 }
 0x101   : > { %737 = vst.msk [vmem:[%s214_s26] sm:$0xff] %vm736_vm1, %v980_v35  ;;  %v739_v37 = vsub.f32 %v223_v8, %v980_v35 }
 0x102   : > { %742 = vst.msk [vmem:[%s222_s29 + $0x8] sm:$0xff] %vm736_vm1, %v740_v36 }
 0x103   : > { %741 = vst.msk [vmem:[%s222_s29] sm:$0xff] %vm736_vm1, %v739_v37 }
 0x104 PF: > { %s14_s14 = sadd.s32 1, %s1035_s14   ;;  %s1108_s12 = smov %s1031_s13 }
 0x105   : > { %p11_p5 = scmp.ge.s32.totalorder %s14_s14, 4   ;;  %s1109_s13 = smov %s1111_s15 }
 0x107   :  { %13 = sbr.rel (!%p11_p5) target bundleno = 2 (0x2), region = 70 }

</bundles_post_ra>
